<compile_context>
chip_gen: v7x
topology: tpu7x:2x2x1
jax: 0.10.0
libtpu: 0.0.40
codegen_flags: <defaults>
</compile_context>

<pallas_src>
import functools

import numpy as np

import jax
import jax.numpy as jnp
from jax.experimental import pallas as pl
from jax.experimental.pallas import tpu as pltpu

HIDDEN = 128


def _policy_kernel(x_ref, w_hid_ref, w_out_ref, b_ref, out_ref):
    # x_ref:     (bm, obs_dim)   raw, unpadded state tile (f32)
    # w_hid_ref: (obs_dim, 256)  folded  W_in @ [W_a1 | W_s1]        (compute dtype)
    # w_out_ref: (256, 128)      [[w_ao | 0], [0 | w_so]] zero-pad   (compute dtype)
    # b_ref:     (1, 384)        [ folded hidden bias(256) | padded output bias(128) ] f32
    # out_ref:   (bm, 128)       lane-dense: [ action_prob | state_value | 0.5-pad ]
    cdt = w_hid_ref.dtype
    x = x_ref[...].astype(cdt)

    b_hid = b_ref[:, : 2 * HIDDEN]
    b_out = b_ref[:, 2 * HIDDEN:]

    # Layers 1+2 fused (input layer pre-folded into hidden weights at pack time):
    #   hs[:, :128] = sigmoid(x @ (W_in@W_a1) + (b_in@W_a1 + b_a1)) = a1
    #   hs[:, 128:] = sigmoid(x @ (W_in@W_s1) + (b_in@W_s1 + b_s1)) = s1
    hs = jax.nn.sigmoid(
        jnp.dot(x, w_hid_ref[...], preferred_element_type=jnp.float32) + b_hid)

    # Fused output heads: single (bm,256)@(256,128) matmul, single lane-dense store.
    out = jax.nn.sigmoid(
        jnp.dot(hs.astype(cdt), w_out_ref[...],
                preferred_element_type=jnp.float32) + b_out)

    out_ref[...] = out.astype(out_ref.dtype)


# ---------------- host-side parameter packing (do once, reuse every rollout step) ----------

def pack_policy_params(params, compute_dtype=jnp.float32):
    """Fold + pack per-layer weights/biases into the fused layout the kernel consumes."""
    obs_dim = int(params["w_in"].shape[0])
    action_dim = int(params["w_ao"].shape[1])
    assert action_dim + 1 <= HIDDEN, "fused output head assumes action_dim + 1 <= 128"

    # Fold the activation-free input layer into the hidden layers. Done in numpy float64
    # so the only numerical difference vs the reference is fp reassociation.
    w_in = np.asarray(params["w_in"], np.float64)                       # (obs, 128)
    b_in = np.asarray(params["b_in"], np.float64)                       # (1, 128)
    w_hid_cat = np.concatenate([np.asarray(params["w_a1"], np.float64),
                                np.asarray(params["w_s1"], np.float64)], axis=1)  # (128, 256)
    b_hid_cat = np.concatenate([np.asarray(params["b_a1"], np.float64),
                                np.asarray(params["b_s1"], np.float64)], axis=1)  # (1, 256)
    w_fold = (w_in @ w_hid_cat).astype(np.float32)                      # (obs, 256)
    b_fold = (b_in @ w_hid_cat + b_hid_cat).astype(np.float32)          # (1, 256)

    # (256, 128): actor head reads rows 0..127 (a1), critic head reads rows 128..255 (s1).
    w_out = np.zeros((2 * HIDDEN, HIDDEN), np.float32)
    w_out[:HIDDEN, :action_dim] = np.asarray(params["w_ao"], np.float32)
    w_out[HIDDEN:, action_dim:action_dim + 1] = np.asarray(params["w_so"], np.float32)

    # (1, 128): output biases; padded lanes get 0 (their sigmoid(0)=0.5 is sliced off).
    b_out = np.zeros((1, HIDDEN), np.float32)
    b_out[:, :action_dim] = np.asarray(params["b_ao"], np.float32)
    b_out[:, action_dim:action_dim + 1] = np.asarray(params["b_so"], np.float32)

    b_all = np.concatenate([b_fold, b_out], axis=1)                     # (1, 384)

    return {
        "w_hid": jnp.asarray(w_fold, compute_dtype),
        "w_out": jnp.asarray(w_out, compute_dtype),
        "b_all": jnp.asarray(b_all, jnp.float32),   # bias-add + sigmoid stay f32
        "obs_dim": obs_dim,
        "action_dim": action_dim,
    }


def _round_up(n, m):
    return ((n + m - 1) // m) * m


@functools.partial(jax.jit, static_argnames=("action_dim", "bm"))
def policy_forward(state, w_hid, w_out, b_all, *, action_dim, bm=1024):
    """state: (B, obs_dim). Returns (action_prob (B, action_dim), state_value (B, 1))."""
    state = state.astype(jnp.float32)
    B, obs_dim = state.shape
    bm_eff = min(bm, _round_up(B, 8))          # batch tile (second-minor must be 8-aligned)
    grid = (pl.cdiv(B, bm_eff),)

    out = pl.pallas_call(
        _policy_kernel,
        out_shape=jax.ShapeDtypeStruct((B, HIDDEN), jnp.float32),
        grid=grid,
        in_specs=[
            pl.BlockSpec((bm_eff, obs_dim), lambda i: (i, 0)),       # state: batch-tiled
            pl.BlockSpec((obs_dim, 2 * HIDDEN), lambda i: (0, 0)),   # weights: VMEM-resident
            pl.BlockSpec((2 * HIDDEN, HIDDEN), lambda i: (0, 0)),    #   (same block every step)
            pl.BlockSpec((1, 3 * HIDDEN), lambda i: (0, 0)),
        ],
        out_specs=pl.BlockSpec((bm_eff, HIDDEN), lambda i: (i, 0)),
        compiler_params=pltpu.CompilerParams(
            dimension_semantics=("parallel",)),                      # v7x: 2 TCs share batch
    )(state, w_hid, w_out, b_all)

    action_prob = out[:, :action_dim]
    state_value = out[:, action_dim:action_dim + 1]
    return action_prob, state_value


# ---------------- deterministic parameter init (mirrors the PyTorch init scheme) ------------

def _kaiming_uniform(key, fan_in, fan_out):
    bound = jnp.sqrt(6.0 / fan_in)
    return jax.random.uniform(key, (fan_in, fan_out), jnp.float32, -bound, bound)


def _linear_bias(key, fan_in, fan_out):
    bound = 1.0 / jnp.sqrt(jnp.float32(fan_in))
    return jax.random.uniform(key, (1, fan_out), jnp.float32, -bound, bound)


def init_policy_params(key, obs_dim, action_dim, hidden=HIDDEN):
    ks = jax.random.split(key, 10)
    return {
        "w_in": _kaiming_uniform(ks[0], obs_dim, hidden),
        "b_in": _linear_bias(ks[1], obs_dim, hidden),
        "w_a1": _kaiming_uniform(ks[2], hidden, hidden),
        "b_a1": _linear_bias(ks[3], hidden, hidden),
        "w_ao": _kaiming_uniform(ks[4], hidden, action_dim),
        "b_ao": _linear_bias(ks[5], hidden, action_dim),
        "w_s1": _kaiming_uniform(ks[6], hidden, hidden),
        "b_s1": _linear_bias(ks[7], hidden, hidden),
        "w_so": _kaiming_uniform(ks[8], hidden, 1),
        "b_so": _linear_bias(ks[9], hidden, 1),
    }


def _reference_forward(state, p):
    h = state @ p["w_in"] + p["b_in"]
    a1 = jax.nn.sigmoid(h @ p["w_a1"] + p["b_a1"])
    ap = jax.nn.sigmoid(a1 @ p["w_ao"] + p["b_ao"])
    s1 = jax.nn.sigmoid(h @ p["w_s1"] + p["b_s1"])
    sv = jax.nn.sigmoid(s1 @ p["w_so"] + p["b_so"])
    return ap, sv


if __name__ == "__main__":
    # CartPole-like env: observation_dim=4, discrete action_dim=2
    OBS_DIM, ACTION_DIM = 4, 2

    key = jax.random.PRNGKey(0)
    k_params, k_small, k_big = jax.random.split(key, 3)
    params = init_policy_params(k_params, OBS_DIM, ACTION_DIM)

    # ---- small batch, f32 weight slabs: tight numerical check vs reference ----
    packed32 = pack_policy_params(params, compute_dtype=jnp.float32)
    state_small = jax.random.normal(k_small, (8, OBS_DIM), jnp.float32)
    ap, sv = jax.block_until_ready(policy_forward(
        state_small, packed32["w_hid"], packed32["w_out"], packed32["b_all"],
        action_dim=packed32["action_dim"]))
    ap_ref, sv_ref = _reference_forward(state_small, params)
    assert ap.shape == (8, ACTION_DIM) and sv.shape == (8, 1)
    assert jnp.allclose(ap, ap_ref, atol=1e-5, rtol=1e-5)
    assert jnp.allclose(sv, sv_ref, atol=1e-5, rtol=1e-5)

    # ---- rollout-sized batch, bf16 weight slabs: exercises the batch grid + MXU path ----
    packed16 = pack_policy_params(params, compute_dtype=jnp.bfloat16)
    state_big = jax.random.normal(k_big, (1024, OBS_DIM), jnp.float32)
    ap_b, sv_b = jax.block_until_ready(policy_forward(
        state_big, packed16["w_hid"], packed16["w_out"], packed16["b_all"],
        action_dim=packed16["action_dim"], bm=256))
    ap_ref_b, sv_ref_b = _reference_forward(state_big, params)
    assert ap_b.shape == (1024, ACTION_DIM) and sv_b.shape == (1024, 1)
    assert jnp.allclose(ap_b, ap_ref_b, atol=5e-2, rtol=5e-2)
    assert jnp.allclose(sv_b, sv_ref_b, atol=5e-2, rtol=5e-2)

    print("KERNEL_OK")
</pallas_src>

<mosaic_0001>
module attributes {stable_mosaic.version = 11 : i64} {
  func.func @_policy_kernel(%arg0: i32, %arg1: memref<8x4xf32, #tpu.memory_space<vmem>>, %arg2: memref<4x256xf32, #tpu.memory_space<vmem>>, %arg3: memref<256x128xf32, #tpu.memory_space<vmem>>, %arg4: memref<1x384xf32, #tpu.memory_space<vmem>>, %arg5: memref<8x128xf32, #tpu.memory_space<vmem>>) attributes {dimension_semantics = [#tpu.dimension_semantics<parallel>], iteration_bounds = array<i64: 1>, scalar_prefetch = 0 : i64, scratch_operands = 0 : i64, tpu.core_type = #tpu.core_type<tc>, window_params = [{transform_indices = @transform_0, window_bounds = array<i64: 8, 4>}, {pipeline_mode = #tpu.pipeline_mode<synchronous>, transform_indices = @transform_1, window_bounds = array<i64: 4, 256>}, {pipeline_mode = #tpu.pipeline_mode<synchronous>, transform_indices = @transform_2, window_bounds = array<i64: 256, 128>}, {pipeline_mode = #tpu.pipeline_mode<synchronous>, transform_indices = @transform_3, window_bounds = array<i64: 1, 384>}, {transform_indices = @transform_4, window_bounds = array<i64: 8, 128>}]} {
    %c0 = arith.constant 0 : index
    %c0_0 = arith.constant 0 : index
    %0 = vector.load %arg1[%c0, %c0_0] : memref<8x4xf32, #tpu.memory_space<vmem>>, vector<8x4xf32>
    %c0_1 = arith.constant 0 : index
    %c0_2 = arith.constant 0 : index
    %1 = vector.load %arg4[%c0_1, %c0_2] : memref<1x384xf32, #tpu.memory_space<vmem>>, vector<1x256xf32>
    %c0_3 = arith.constant 0 : index
    %c256 = arith.constant 256 : index
    %2 = vector.load %arg4[%c0_3, %c256] : memref<1x384xf32, #tpu.memory_space<vmem>>, vector<1x128xf32>
    %c0_4 = arith.constant 0 : index
    %c0_5 = arith.constant 0 : index
    %3 = vector.load %arg2[%c0_4, %c0_5] : memref<4x256xf32, #tpu.memory_space<vmem>>, vector<4x256xf32>
    %cst = arith.constant dense<0.000000e+00> : vector<8x256xf32>
    %4 = tpu.matmul %0, %3, %cst {dimension_numbers = #tpu.dot_dimension_numbers<[1], [0], [0], [1], [0, 0, 1, 1], [], []>} : vector<8x4xf32>, vector<4x256xf32>, vector<8x256xf32> -> vector<8x256xf32>
    %5 = vector.broadcast %1 : vector<1x256xf32> to vector<8x256xf32>
    %6 = arith.addf %4, %5 : vector<8x256xf32>
    %7 = arith.negf %6 : vector<8x256xf32>
    %8 = math.exp %7 : vector<8x256xf32>
    %cst_6 = arith.constant 1.000000e+00 : f32
    %9 = vector.broadcast %cst_6 : f32 to vector<8x256xf32>
    %10 = arith.addf %9, %8 : vector<8x256xf32>
    %11 = arith.divf %9, %10 : vector<8x256xf32>
    %c0_7 = arith.constant 0 : index
    %c0_8 = arith.constant 0 : index
    %12 = vector.load %arg3[%c0_7, %c0_8] : memref<256x128xf32, #tpu.memory_space<vmem>>, vector<256x128xf32>
    %cst_9 = arith.constant dense<0.000000e+00> : vector<8x128xf32>
    %13 = tpu.matmul %11, %12, %cst_9 {dimension_numbers = #tpu.dot_dimension_numbers<[1], [0], [0], [1], [0, 0, 1, 1], [], []>} : vector<8x256xf32>, vector<256x128xf32>, vector<8x128xf32> -> vector<8x128xf32>
    %14 = vector.broadcast %2 : vector<1x128xf32> to vector<8x128xf32>
    %15 = arith.addf %13, %14 : vector<8x128xf32>
    %16 = arith.negf %15 : vector<8x128xf32>
    %17 = math.exp %16 : vector<8x128xf32>
    %cst_10 = arith.constant 1.000000e+00 : f32
    %18 = vector.broadcast %cst_10 : f32 to vector<8x128xf32>
    %19 = arith.addf %18, %17 : vector<8x128xf32>
    %20 = arith.divf %18, %19 : vector<8x128xf32>
    %c0_11 = arith.constant 0 : index
    %c0_12 = arith.constant 0 : index
    %21 = vector.load %arg5[%c0_11, %c0_12] : memref<8x128xf32, #tpu.memory_space<vmem>>, vector<8x128xf32>
    tpu.vector_store %arg5[%c0_11, %c0_12], %20 {strides = array<i32>} : memref<8x128xf32, #tpu.memory_space<vmem>>, vector<8x128xf32>,
    return
  }
  func.func @transform_0(%arg0: i32) -> (i32, i32) {
    %c0_i32 = arith.constant 0 : i32
    %c0_i32_0 = arith.constant 0 : i32
    return %arg0, %c0_i32 : i32, i32
  }
  func.func @transform_1(%arg0: i32) -> (i32, i32) {
    %c0_i32 = arith.constant 0 : i32
    %c0_i32_0 = arith.constant 0 : i32
    %c0_i32_1 = arith.constant 0 : i32
    return %c0_i32, %c0_i32_0 : i32, i32
  }
  func.func @transform_2(%arg0: i32) -> (i32, i32) {
    %c0_i32 = arith.constant 0 : i32
    %c0_i32_0 = arith.constant 0 : i32
    %c0_i32_1 = arith.constant 0 : i32
    return %c0_i32, %c0_i32_0 : i32, i32
  }
  func.func @transform_3(%arg0: i32) -> (i32, i32) {
    %c0_i32 = arith.constant 0 : i32
    %c0_i32_0 = arith.constant 0 : i32
    %c0_i32_1 = arith.constant 0 : i32
    return %c0_i32, %c0_i32_0 : i32, i32
  }
  func.func @transform_4(%arg0: i32) -> (i32, i32) {
    %c0_i32 = arith.constant 0 : i32
    %c0_i32_0 = arith.constant 0 : i32
    return %arg0, %c0_i32 : i32, i32
  }
}

</mosaic_0001>

<bundles_post_ra>
// kernel: policy_forward.1
= control target key start
LH: loop header
LB: loop body
LE: loop exit
PB: predicated region body
PF: predicated region fallthrough
CT: control target
= control target key end

     0   :  { %9 = vsyncpa [#allocation3], 0  ;;  %s375_s15 = smov [#allocation2]   ;;  %s431_s0 = inlined_call_operand.vmem [shape: f32[8,4], index: 0, kind: input, shape index: {}]   ;;  %s432_s1 = inlined_call_operand.vmem [shape: f32[4,256], index: 1, kind: input, shape index: {}]   ;;  %s433_s2 = inlined_call_operand.hbm [shape: f32[256,128], index: 2, kind: input, shape index: {}]   ;;  %s434_s3 = inlined_call_operand.vmem [shape: f32[1,384], index: 3, kind: input, shape index: {}]   ;;  %s435_s4 = inlined_call_operand.vmem [shape: f32[8,128], index: 4, kind: output, shape index: {}]  }
   0x1   :  { %s19_s16 = sshll.u32 %s375_s15, 4  ;;  %s351_s19 = scalar_lea.hbm %s433_s2, 4096  ;;  %s20_s16 = int_to_ptr.vmem [resolvable:$true] %s19_s16 }
   0x2   :  { %p352_p0 = scmp.ne.s32.totalorder %s433_s2, %s351_s19  ;;  %p355_p1 = scmp.lt.u32.totalorder %s351_s19, %s433_s2 }
   0x4   :  { %p357_p2 = pnand %p355_p1, %p352_p0 }
   0x6   :  { %360 = shalt.err (!%p357_p2)
}
   0x7   :  { %s361_s24 = scalar_lea.vmem %s20_s16, 4096  ;;  %p366_p4 = scmp.lt.s32.totalorder %s20_s16, %s20_s16 }
   0x8   :  { %p362_p3 = scmp.ne.s32.totalorder %s20_s16, %s361_s24  ;;  %p367_p5 = scmp.lt.s32.totalorder %s361_s24, %s361_s24 }
   0xa   :  { %p368_p6 = por %p367_p5, %p366_p4 }
   0xc   :  { %p369_p7 = pnand %p368_p6, %p362_p3 }
   0xe   :  { %372 = shalt.err (!%p369_p7)
}
   0xf   :  { %s376_s25 = smov 128   ;;  %s377_s26 = smov 8  }
  0x10   :  { %25 = dma.hbm_to_vmem [thread:$0]  %s433_s2, 4096, %s20_s16, [#allocation3], %s376_s25, %s376_s25, %s377_s26  }
  0x11   :  { %373 = dma.done.wait [#allocation3], 4096  }
  0x12   :  { %374 = vsyncadd [#allocation3], 4294963200  ;;  %v378_v0 = vmov 0.0   ;;  %v34_v1 = vld [vmem:[%s432_s1] sm:$0xff]  ;;  %vm52_vm0 = vcmask 1043456   ;;  %v157_v4 = vld [vmem:[#allocation2 + $0x88] sm:$0xff]  ;;  %v36_v52 = vlaneseq }
  0x13   :  { %121 = vmatprep.mubr.f32.mxu0 %v378_v0  ;;  %v156_v2 = vld [vmem:[#allocation2 + $0x80] sm:$0xff]  ;;  %v47_v3 = vcombine.high %v34_v1, %v34_v1  ;;  %vm48_vm1 = vcmask 31744   ;;  %v141_v8 = vld [vmem:[#allocation2 + $0x8] sm:$0xff]  ;;  %v158_v10 = vld [vmem:[#allocation2 + $0x90] sm:$0xff] }
  0x14   :  { %v31_v5 = vld [vmem:[%s431_s0] sm:$0xff]  ;;  %v302_v6 = vpack.c.bf16 %v157_v4, %v156_v2  ;;  %v159_v11 = vld [vmem:[#allocation2 + $0x98] sm:$0xff]  ;;  %v142_v13 = vld [vmem:[#allocation2 + $0x10] sm:$0xff]  ;;  %v37_v53 = vshrl.u32 %v36_v52, 7 }
  0x15   :  { %260 = vmatprep.subr.msk.mxu0 %vm52_vm0, %v47_v3  ;;  %v140_v7 = vld [vmem:[#allocation2] sm:$0xff]  ;;  %v306_v12 = vpack.c.bf16 %v159_v11, %v158_v10  ;;  %v143_v14 = vld [vmem:[#allocation2 + $0x18] sm:$0xff]  ;;  %v161_v17 = vld [vmem:[#allocation2 + $0xa8] sm:$0xff] }
  0x16   :  { %261 = vmatpush1.msk.msra.mxu0 %vm52_vm0, %v34_v1  ;;  %303 = vmatprep.subr.bf16.mxu1 %v302_v6  ;;  %v304_v9 = vpack.c.bf16 %v141_v8, %v140_v7  ;;  %v308_v15 = vpack.c.bf16 %v143_v14, %v142_v13  ;;  %v160_v16 = vld [vmem:[#allocation2 + $0xa0] sm:$0xff]  ;;  %v145_v20 = vld [vmem:[#allocation2 + $0x28] sm:$0xff]  ;;  %v162_v22 = vld [vmem:[#allocation2 + $0xb0] sm:$0xff]  ;;  %v38_v54 = vsub.s32 0, %v37_v53  ;;  %v42_v56 = vsub.s32 1, %v37_v53 }
  0x17   :  { %262 = vmatmul.mubr.msk.f32.vlgmr.msra.gmra.mrb[0].mxu0 %vm48_vm1, %v31_v5  ;;  %v310_v18 = vpack.c.bf16 %v161_v17, %v160_v16  ;;  %v144_v19 = vld [vmem:[#allocation2 + $0x20] sm:$0xff]  ;;  %v163_v23 = vld [vmem:[#allocation2 + $0xb8] sm:$0xff]  ;;  %v146_v25 = vld [vmem:[#allocation2 + $0x30] sm:$0xff] }
  0x18   :  { %305 = vmatpush3.bf16.msra.mxu1 %v304_v9  ;;  %v312_v21 = vpack.c.bf16 %v145_v20, %v144_v19  ;;  %v314_v24 = vpack.c.bf16 %v163_v23, %v162_v22  ;;  %v147_v26 = vld [vmem:[#allocation2 + $0x38] sm:$0xff]  ;;  %v164_v28 = vld [vmem:[#allocation2 + $0xc0] sm:$0xff]  ;;  %v165_v29 = vld [vmem:[#allocation2 + $0xc8] sm:$0xff] }
  0x19   :  { %307 = vmatprep.subr.bf16.mxu1 %v306_v12  ;;  %v316_v27 = vpack.c.bf16 %v147_v26, %v146_v25  ;;  %v318_v30 = vpack.c.bf16 %v165_v29, %v164_v28  ;;  %v148_v31 = vld [vmem:[#allocation2 + $0x40] sm:$0xff]  ;;  %v149_v32 = vld [vmem:[#allocation2 + $0x48] sm:$0xff]  ;;  %v166_v34 = vld [vmem:[#allocation2 + $0xd0] sm:$0xff] }
  0x1a   :  { %v320_v33 = vpack.c.bf16 %v149_v32, %v148_v31  ;;  %v167_v35 = vld [vmem:[#allocation2 + $0xd8] sm:$0xff]  ;;  %v150_v37 = vld [vmem:[#allocation2 + $0x50] sm:$0xff]  ;;  %v168_v40 = vld [vmem:[#allocation2 + $0xe0] sm:$0xff] }
  0x1b   :  { %v322_v36 = vpack.c.bf16 %v167_v35, %v166_v34  ;;  %v151_v38 = vld [vmem:[#allocation2 + $0x58] sm:$0xff]  ;;  %v169_v41 = vld [vmem:[#allocation2 + $0xe8] sm:$0xff]  ;;  %v152_v42 = vld [vmem:[#allocation2 + $0x60] sm:$0xff] }
  0x1c   :  { %309 = vmatpush3.bf16.msra.mxu1 %v308_v15  ;;  %v324_v39 = vpack.c.bf16 %v151_v38, %v150_v37  ;;  %v326_v43 = vpack.c.bf16 %v169_v41, %v168_v40  ;;  %v153_v44 = vld [vmem:[#allocation2 + $0x68] sm:$0xff]  ;;  %v170_v45 = vld [vmem:[#allocation2 + $0xf0] sm:$0xff]  ;;  %v171_v46 = vld [vmem:[#allocation2 + $0xf8] sm:$0xff] }
  0x1d   :  { %311 = vmatprep.subr.bf16.mxu1 %v310_v18  ;;  %v328_v47 = vpack.c.bf16 %v153_v44, %v152_v42  ;;  %v330_v48 = vpack.c.bf16 %v171_v46, %v170_v45  ;;  %v154_v49 = vld [vmem:[#allocation2 + $0x70] sm:$0xff]  ;;  %v155_v50 = vld [vmem:[#allocation2 + $0x78] sm:$0xff]  ;;  %v32_v55 = vld [vmem:[%s434_s3] sm:$0x3] }
  0x1e   :  { %v332_v51 = vpack.c.bf16 %v155_v50, %v154_v49  ;;  %v39_v57 = vrot.slane %v32_v55, %v38_v54  ;;  %v43_v58 = vrot.slane %v32_v55, %v42_v56  ;;  %v265_v8 = vld [vmem:[%s434_s3 + $0x2] ss:$0 sm:$0xff] }
  0x20   :  { %313 = vmatpush3.bf16.msra.mxu1 %v312_v21 }
  0x21   :  { %315 = vmatprep.subr.bf16.mxu1 %v314_v24 }
  0x24   :  { %317 = vmatpush3.bf16.msra.mxu1 %v316_v27 }
  0x25   :  { %319 = vmatprep.subr.bf16.mxu1 %v318_v30 }
  0x28   :  { %321 = vmatpush3.bf16.msra.mxu1 %v320_v33 }
  0x29   :  { %323 = vmatprep.subr.bf16.mxu1 %v322_v36 }
  0x2c   :  { %325 = vmatpush3.bf16.msra.mxu1 %v324_v39 }
  0x2d   :  { %327 = vmatprep.subr.bf16.mxu1 %v326_v43 }
  0x30   :  { %329 = vmatpush3.bf16.msra.mxu1 %v328_v47 }
  0x31   :  { %331 = vmatprep.subr.bf16.mxu1 %v330_v48 }
  0x34   :  { %333 = vmatpush3.bf16.msra.mxu1 %v332_v51 }
  0xea   :  { %v123_v59 = vpop.f32.mrb[0].mxu0 }
  0xeb   :  { %v124_v60 = vadd.f32 %v123_v59, %v39_v57  ;;  %v125_v61 = vpop.f32.mrb[1].mxu0 }
  0xec   :  { %v126_v62 = vadd.f32 %v125_v61, %v43_v58 }
  0xed   :  { %v263_v63 = vmul.f32 -1.442695, %v124_v60 }
  0xee   :  { %v264_v0 = vmul.f32 -1.442695, %v126_v62 }
  0xef   :  { %339 = vpow2.f32 %v263_v63 }
  0xf0   :  { %341 = vpow2.f32 %v264_v0 }
  0xf9   :  { %v340_v1 = vpop.eup %339 }
  0xfa   :  { %v342_v2 = vpop.eup %341  ;;  %v134_v3 = vadd.f32 1.0, %v340_v1 }
  0xfb   :  { %v135_v4 = vadd.f32 1.0, %v342_v2 }
  0xfd   :  { %343 = vrcp.f32 %v135_v4 }
  0xfe   :  { %345 = vrcp.f32 %v134_v3 }
 0x107   :  { %v344_v5 = vpop.eup %343 }
 0x108   :  { %v346_v6 = vpop.eup %345  ;;  %242 = vmatprep.mubr.f32.mxu1 %v344_v5 }
 0x109   :  { %243 = vmatmul.mubr.f32.vlgmr.msra.gmra.mrb[0].mxu1 %v346_v6 }
 0x1dc   :  { %v299_v7 = vpop.f32.mrb[0].mxu1 }
 0x1dd   :  { %v300_v9 = vpop.f32.mrb[1].mxu1 }
 0x1de   :  { %v301_v10 = vadd.f32 %v300_v9, %v299_v7 }
 0x1e0   :  { %v245_v11 = vadd.f32 %v301_v10, %v265_v8 }
 0x1e2   :  { %v266_v12 = vmul.f32 -1.442695, %v245_v11 }
 0x1e4   :  { %347 = vpow2.f32 %v266_v12 }
 0x1ee   :  { %v348_v13 = vpop.eup %347 }
 0x1ef   :  { %v251_v14 = vadd.f32 1.0, %v348_v13 }
 0x1f1   :  { %349 = vrcp.f32 %v251_v14 }
 0x1fb   :  { %v350_v15 = vpop.eup %349 }
 0x1fc   :  { %254 = vst [vmem:[%s435_s4] sm:$0xff] %v350_v15 }
 0x1fd   :  { %259 = vsyncpa [#allocation3], 1 }

</bundles_post_ra>
